<compile_context>
chip_gen: v7x
topology: tpu7x:2x2x1
jax: 0.10.0
libtpu: 0.0.40
codegen_flags: <defaults>
</compile_context>

<pallas_src>
import functools
import math

import jax
import jax.numpy as jnp
from jax.experimental import pallas as pl
from jax.experimental.pallas import tpu as pltpu


# ---------------------------------------------------------------------------
# Fused path: the whole spatial extent L of a row block fits in one tile.
# ---------------------------------------------------------------------------
def _fused_kernel(x_ref, *rest, eps, inv_l, affine):
    if affine:
        wb_ref, o_ref = rest
    else:
        (o_ref,) = rest

    x = x_ref[...].astype(jnp.float32)
    # Single-pass stats.  The logical block width is exactly L, so no lane
    # masking is needed; OOB *rows* of the edge block compute garbage that is
    # confined to those rows and never stored (masked writeback).
    s = jnp.sum(x, axis=-1, keepdims=True)
    sq = jnp.sum(x * x, axis=-1, keepdims=True)
    mean = s * inv_l
    var = jnp.maximum(sq * inv_l - mean * mean, 0.0)  # clamp: can round < 0
    inv = jax.lax.rsqrt(var + eps)

    if affine:
        wb = wb_ref[...]                      # (rows, 2) f32: [:,0]=w, [:,1]=b
        scale = inv * wb[:, 0:1]
        shift = wb[:, 1:2] - mean * scale
    else:
        scale = inv
        shift = -mean * inv
    o_ref[...] = (x * scale + shift).astype(o_ref.dtype)


# ---------------------------------------------------------------------------
# Streamed two-pass path for very large L.
# ---------------------------------------------------------------------------
def _stats_kernel(x_ref, mean_ref, inv_ref, *, eps, inv_l, true_l, tl, need_mask):
    """Pass 1: accumulate sum / sumsq over L chunks, finalize (mean, inv)."""
    li = pl.program_id(1)

    @pl.when(li == 0)
    def _():
        mean_ref[...] = jnp.zeros_like(mean_ref)   # running sum(x)
        inv_ref[...] = jnp.zeros_like(inv_ref)     # running sum(x*x)

    x = x_ref[...].astype(jnp.float32)
    if need_mask:
        # Last chunk extends past L: OOB lanes would pollute the row sums.
        lane = jax.lax.broadcasted_iota(jnp.int32, x.shape, 1) + li * tl
        x = jnp.where(lane < true_l, x, 0.0)

    mean_ref[...] += jnp.sum(x, axis=-1, keepdims=True)
    inv_ref[...] += jnp.sum(x * x, axis=-1, keepdims=True)

    @pl.when(li == pl.num_programs(1) - 1)
    def _():
        m = mean_ref[...] * inv_l
        v = jnp.maximum(inv_ref[...] * inv_l - m * m, 0.0)
        mean_ref[...] = m
        inv_ref[...] = jax.lax.rsqrt(v + eps)


def _apply_kernel(x_ref, mean_ref, inv_ref, *rest, affine):
    """Pass 2: normalize an (rows, tl) chunk with the per-row (mean, inv)."""
    if affine:
        wb_ref, o_ref = rest
    else:
        (o_ref,) = rest

    x = x_ref[...].astype(jnp.float32)
    mean = mean_ref[...]
    inv = inv_ref[...]
    if affine:
        wb = wb_ref[...]
        scale = inv * wb[:, 0:1]
        shift = wb[:, 1:2] - mean * scale
    else:
        scale = inv
        shift = -mean * inv
    o_ref[...] = (x * scale + shift).astype(o_ref.dtype)


# ---------------------------------------------------------------------------
# Wrapper.
# ---------------------------------------------------------------------------
def instance_norm(x, weight=None, bias=None, *, eps=1e-5, dims=2,
                  has_batch_dim=True, _force_chunk=None):
    """InstanceNorm forward.  x: ([B,] C, *spatial), len(spatial) == dims."""
    if not has_batch_dim:
        return instance_norm(x[None], weight, bias, eps=eps, dims=dims,
                             _force_chunk=_force_chunk)[0]
    assert x.ndim == dims + 2, (x.ndim, dims)
    B, C = x.shape[0], x.shape[1]
    L = math.prod(x.shape[2:])
    R = B * C

    itemsize = jnp.dtype(x.dtype).itemsize
    row_q = max(8, 32 // max(itemsize, 1))        # sublane quantum: 8 f32, 16 bf16

    # VMEM-aware block budget: ~vmem/16 f32 tile target (8 MiB on 128 MiB
    # v5e/v6e, 4 MiB on 64 MiB-per-TC v7x); scoped limit ~3/4 of physical.
    try:
        vmem_cap = int(pltpu.get_tpu_info().vmem_capacity_bytes)
    except Exception:
        vmem_cap = 64 * 1024 * 1024               # conservative fallback
    target_tile_f32 = max(1 << 20, min(8 << 20, vmem_cap // 16))
    vmem_limit = min(vmem_cap * 3 // 4, 100 * 1024 * 1024)

    x2 = x.reshape(R, L)                          # free: contiguous view

    affine = weight is not None
    wb = None
    if affine:
        if bias is None:
            bias = jnp.zeros((C,), jnp.float32)
        w_rows = jnp.tile(weight.astype(jnp.float32).reshape(C), (B,))
        b_rows = jnp.tile(bias.astype(jnp.float32).reshape(C), (B,))
        wb = jnp.stack([w_rows, b_rows], axis=1)  # (R, 2) f32: one DMA per step

    rows_budget = (target_tile_f32 // (L * 4)) // row_q * row_q
    use_chunked = rows_budget < row_q or _force_chunk is not None

    if not use_chunked:
        # Cap rows so the grid has >= 2 steps whenever R allows it
        # (double-buffer overlap everywhere; both TensorCores on v7x).
        rows_cap = ((pl.cdiv(R, 2) + row_q - 1) // row_q) * row_q
        rows = max(row_q, min(rows_budget, rows_cap))
        grid = (pl.cdiv(R, rows),)

        in_specs = [pl.BlockSpec((rows, L), lambda r: (r, 0))]
        operands = [x2]
        if affine:
            in_specs.append(pl.BlockSpec((rows, 2), lambda r: (r, 0)))
            operands.append(wb)

        out = pl.pallas_call(
            functools.partial(_fused_kernel, eps=float(eps),
                              inv_l=1.0 / float(L), affine=affine),
            out_shape=jax.ShapeDtypeStruct((R, L), x.dtype),
            grid_spec=pltpu.PrefetchScalarGridSpec(
                num_scalar_prefetch=0, grid=grid,
                in_specs=in_specs,
                out_specs=pl.BlockSpec((rows, L), lambda r: (r, 0))),
            compiler_params=pltpu.CompilerParams(
                dimension_semantics=("parallel",),
                vmem_limit_bytes=vmem_limit),
        )(*operands)
        return out.reshape(x.shape)

    # ---------------- streamed two-pass path (very large L) ----------------
    if _force_chunk is not None:
        tl = int(_force_chunk)
    else:
        tl = max(128, (target_tile_f32 // (row_q * 4)) // 128 * 128)
    tl = min(tl, ((L + 127) // 128) * 128)        # lane-dense chunk width
    n_r = pl.cdiv(R, row_q)
    n_l = pl.cdiv(L, tl)
    need_mask = (L % tl) != 0
    grid = (n_r, n_l)

    # Pass 1: per-row (mean, inv) over L chunks (reduction axis last, arbitrary).
    mean_arr, inv_arr = pl.pallas_call(
        functools.partial(_stats_kernel, eps=float(eps), inv_l=1.0 / float(L),
                          true_l=L, tl=tl, need_mask=need_mask),
        out_shape=(jax.ShapeDtypeStruct((R, 1), jnp.float32),
                   jax.ShapeDtypeStruct((R, 1), jnp.float32)),
        grid_spec=pltpu.PrefetchScalarGridSpec(
            num_scalar_prefetch=0, grid=grid,
            in_specs=[pl.BlockSpec((row_q, tl), lambda r, l: (r, l))],
            out_specs=[pl.BlockSpec((row_q, 1), lambda r, l: (r, 0)),
                       pl.BlockSpec((row_q, 1), lambda r, l: (r, 0))]),
        compiler_params=pltpu.CompilerParams(
            dimension_semantics=("parallel", "arbitrary"),
            vmem_limit_bytes=vmem_limit),
    )(x2)

    # Pass 2: stream the same chunks and normalize.
    in_specs = [pl.BlockSpec((row_q, tl), lambda r, l: (r, l)),
                pl.BlockSpec((row_q, 1), lambda r, l: (r, 0)),
                pl.BlockSpec((row_q, 1), lambda r, l: (r, 0))]
    operands = [x2, mean_arr, inv_arr]
    if affine:
        in_specs.append(pl.BlockSpec((row_q, 2), lambda r, l: (r, 0)))
        operands.append(wb)

    out = pl.pallas_call(
        functools.partial(_apply_kernel, affine=affine),
        out_shape=jax.ShapeDtypeStruct((R, L), x.dtype),
        grid_spec=pltpu.PrefetchScalarGridSpec(
            num_scalar_prefetch=0, grid=grid,
            in_specs=in_specs,
            out_specs=pl.BlockSpec((row_q, tl), lambda r, l: (r, l))),
        compiler_params=pltpu.CompilerParams(
            dimension_semantics=("parallel", "parallel"),
            vmem_limit_bytes=vmem_limit),
    )(*operands)
    return out.reshape(x.shape)


# ---------------------------------------------------------------------------
# Reference + tests.
# ---------------------------------------------------------------------------
def _reference_instance_norm(x, weight, bias, eps, dims):
    red_axes = tuple(range(x.ndim - dims, x.ndim))
    xf = x.astype(jnp.float32)
    mean = jnp.mean(xf, axis=red_axes, keepdims=True)
    var = jnp.mean((xf - mean) ** 2, axis=red_axes, keepdims=True)
    xbar = (xf - mean) / jnp.sqrt(var + eps)
    if weight is not None:
        shape = (1, x.shape[1]) + (1,) * dims
        xbar = xbar * weight.reshape(shape) + bias.reshape(shape)
    return xbar.astype(x.dtype)


if __name__ == "__main__":
    key = jax.random.PRNGKey(0)
    eps = 1e-5
    dims = 2

    # --- primary: PyTorch default (affine=False), B=2, C=4, 16x16 ---
    B, C, H, W = 2, 4, 16, 16
    k0, k1, k2, k3, k4 = jax.random.split(key, 5)
    x = jax.random.normal(k0, (B, C, H, W), dtype=jnp.float32)

    y = jax.block_until_ready(instance_norm(x, eps=eps, dims=dims))
    y_ref = _reference_instance_norm(x, None, None, eps, dims)
    assert y.shape == x.shape and y.dtype == x.dtype
    assert jnp.allclose(y, y_ref, atol=1e-5, rtol=1e-5), "no-affine mismatch"

    # --- affine path with non-trivial weight/bias ---
    weight = 1.0 + 0.1 * jax.random.normal(k1, (C,), dtype=jnp.float32)
    bias = 0.1 * jax.random.normal(k2, (C,), dtype=jnp.float32)
    ya = jax.block_until_ready(instance_norm(x, weight, bias, eps=eps, dims=dims))
    ya_ref = _reference_instance_norm(x, weight, bias, eps, dims)
    assert jnp.allclose(ya, ya_ref, atol=1e-5, rtol=1e-5), "affine mismatch"

    # --- L not a multiple of 128 (7x7 spatial): masked-store fused path ---
    x2 = jax.random.normal(k3, (B, C, 7, 7), dtype=jnp.float32)
    y2 = jax.block_until_ready(instance_norm(x2, eps=eps, dims=dims))
    y2_ref = _reference_instance_norm(x2, None, None, eps, dims)
    assert jnp.allclose(y2, y2_ref, atol=1e-5, rtol=1e-5), "non-128 L mismatch"

    # --- streamed two-pass path (forced small chunk), L=400 with edge chunk ---
    x3 = jax.random.normal(k4, (B, C, 20, 20), dtype=jnp.float32)
    y3 = jax.block_until_ready(
        instance_norm(x3, eps=eps, dims=dims, _force_chunk=128))
    y3_ref = _reference_instance_norm(x3, None, None, eps, dims)
    assert jnp.allclose(y3, y3_ref, atol=1e-5, rtol=1e-5), "chunked mismatch"

    y3a = jax.block_until_ready(
        instance_norm(x3, weight, bias, eps=eps, dims=dims, _force_chunk=128))
    y3a_ref = _reference_instance_norm(x3, weight, bias, eps, dims)
    assert jnp.allclose(y3a, y3a_ref, atol=1e-5, rtol=1e-5), "chunked affine mismatch"

    print("KERNEL_OK")
</pallas_src>

<mosaic_0001>
module attributes {stable_mosaic.version = 11 : i64} {
  func.func @_fused_kernel(%arg0: i32, %arg1: memref<8x256xf32, #tpu.memory_space<vmem>>, %arg2: memref<8x256xf32, #tpu.memory_space<vmem>>) attributes {dimension_semantics = [#tpu.dimension_semantics<parallel>], iteration_bounds = array<i64: 1>, scalar_prefetch = 0 : i64, scratch_operands = 0 : i64, tpu.core_type = #tpu.core_type<tc>, window_params = [{transform_indices = @transform_0, window_bounds = array<i64: 8, 256>}, {transform_indices = @transform_1, window_bounds = array<i64: 8, 256>}]} {
    %c0 = arith.constant 0 : index
    %c0_0 = arith.constant 0 : index
    %0 = vector.load %arg1[%c0, %c0_0] : memref<8x256xf32, #tpu.memory_space<vmem>>, vector<8x256xf32>
    %cst = arith.constant dense<0.000000e+00> : vector<8xf32>
    %1 = vector.multi_reduction <add>, %0, %cst [1] : vector<8x256xf32> to vector<8xf32>
    %2 = vector.shape_cast %1 : vector<8xf32> to vector<8x1xf32>
    %3 = arith.mulf %0, %0 : vector<8x256xf32>
    %cst_1 = arith.constant dense<0.000000e+00> : vector<8xf32>
    %4 = vector.multi_reduction <add>, %3, %cst_1 [1] : vector<8x256xf32> to vector<8xf32>
    %5 = vector.shape_cast %4 : vector<8xf32> to vector<8x1xf32>
    %cst_2 = arith.constant 3.906250e-03 : f32
    %6 = vector.broadcast %cst_2 : f32 to vector<8x1xf32>
    %7 = arith.mulf %2, %6 : vector<8x1xf32>
    %cst_3 = arith.constant 3.906250e-03 : f32
    %8 = vector.broadcast %cst_3 : f32 to vector<8x1xf32>
    %9 = arith.mulf %5, %8 : vector<8x1xf32>
    %10 = arith.mulf %7, %7 : vector<8x1xf32>
    %11 = arith.subf %9, %10 : vector<8x1xf32>
    %cst_4 = arith.constant 0.000000e+00 : f32
    %12 = vector.broadcast %cst_4 : f32 to vector<8x1xf32>
    %13 = arith.maximumf %11, %12 : vector<8x1xf32>
    %cst_5 = arith.constant 9.99999974E-6 : f32
    %14 = vector.broadcast %cst_5 : f32 to vector<8x1xf32>
    %15 = arith.addf %13, %14 : vector<8x1xf32>
    %16 = math.rsqrt %15 : vector<8x1xf32>
    %cst_6 = arith.constant 0.000000e+00 : f32
    %17 = vector.broadcast %cst_6 : f32 to vector<8x1xf32>
    %18 = arith.subf %17, %7 : vector<8x1xf32>
    %19 = arith.mulf %18, %16 : vector<8x1xf32>
    %20 = vector.broadcast %16 : vector<8x1xf32> to vector<8x256xf32>
    %21 = arith.mulf %0, %20 : vector<8x256xf32>
    %22 = vector.broadcast %19 : vector<8x1xf32> to vector<8x256xf32>
    %23 = arith.addf %21, %22 : vector<8x256xf32>
    %c0_7 = arith.constant 0 : index
    %c0_8 = arith.constant 0 : index
    %24 = vector.load %arg2[%c0_7, %c0_8] : memref<8x256xf32, #tpu.memory_space<vmem>>, vector<8x256xf32>
    tpu.vector_store %arg2[%c0_7, %c0_8], %23 {strides = array<i32>} : memref<8x256xf32, #tpu.memory_space<vmem>>, vector<8x256xf32>,
    return
  }
  func.func @transform_0(%arg0: i32) -> (i32, i32) {
    %c0_i32 = arith.constant 0 : i32
    %c0_i32_0 = arith.constant 0 : i32
    return %arg0, %c0_i32 : i32, i32
  }
  func.func @transform_1(%arg0: i32) -> (i32, i32) {
    %c0_i32 = arith.constant 0 : i32
    %c0_i32_0 = arith.constant 0 : i32
    return %arg0, %c0_i32 : i32, i32
  }
}

</mosaic_0001>

<bundles_post_ra>
// kernel: tpu_custom_call.1
= control target key start
LH: loop header
LB: loop body
LE: loop exit
PB: predicated region body
PF: predicated region fallthrough
CT: control target
= control target key end

     0   :  { %6 = vsyncpa [#allocation3], 0  ;;  %s149_s0 = inlined_call_operand.hbm [shape: f32[8,256], index: 0, kind: input, shape index: {}]   ;;  %s150_s1 = inlined_call_operand.hbm [shape: f32[8,256], index: 1, kind: output, shape index: {}]  }
   0x1   :  { %7 = vsyncpa [#allocation4], 0  ;;  %s113_s6 = smov [#allocation2]   ;;  %s65_s10 = scalar_lea.hbm %s149_s0, 256 }
   0x2   :  { %s14_s7 = sshll.u32 %s113_s6, 4  ;;  %p66_p0 = scmp.ne.s32.totalorder %s149_s0, %s65_s10  ;;  %s15_s7 = int_to_ptr.vmem [resolvable:$true] %s14_s7 }
   0x3   :  { %p69_p1 = scmp.lt.u32.totalorder %s65_s10, %s149_s0 }
   0x5   :  { %p71_p2 = pnand %p69_p1, %p66_p0 }
   0x7   :  { %74 = shalt.err (!%p71_p2)
}
   0x8   :  { %s75_s15 = scalar_lea.vmem %s15_s7, 256  ;;  %p80_p4 = scmp.lt.s32.totalorder %s15_s7, %s15_s7 }
   0x9   :  { %p76_p3 = scmp.ne.s32.totalorder %s15_s7, %s75_s15  ;;  %p81_p5 = scmp.lt.s32.totalorder %s75_s15, %s75_s15 }
   0xb   :  { %p82_p6 = por %p81_p5, %p80_p4 }
   0xd   :  { %p83_p7 = pnand %p82_p6, %p76_p3 }
   0xf   :  { %86 = shalt.err (!%p83_p7)
}
  0x10   :  { %17 = dma.hbm_to_vmem [thread:$0]  %s149_s0, 256, %s15_s7, [#allocation3]  }
  0x11   :  { %109 = dma.done.wait [#allocation3], 256  }
  0x12   :  { %110 = vsyncadd [#allocation3], 4294967040  ;;  %v21_v0 = vld [vmem:[#allocation2] sm:$0xff]  ;;  %v22_v1 = vld [vmem:[#allocation2 + $0x8] sm:$0xff]  ;;  %s114_s0 = smov [#allocation5]  }
  0x13   :  { %v23_v2 = vadd.f32 %v22_v1, %v21_v0  ;;  %v26_v3 = vmul.f32 %v21_v0, %v21_v0  ;;  %v27_v4 = vmul.f32 %v22_v1, %v22_v1  ;;  %s52_s18 = sshll.u32 %s114_s0, 4  ;;  %s53_s18 = int_to_ptr.vmem [resolvable:$true] %s52_s18 }
  0x14   :  { %s87_s19 = scalar_lea.vmem %s53_s18, 256  ;;  %p92_p9 = scmp.lt.s32.totalorder %s53_s18, %s53_s18 }
  0x15   :  { %24 = vadd.xlane.f32.xlu0 %v23_v2  ;;  %v28_v5 = vadd.f32 %v27_v4, %v26_v3  ;;  %p88_p8 = scmp.ne.s32.totalorder %s53_s18, %s87_s19  ;;  %p93_p10 = scmp.lt.s32.totalorder %s87_s19, %s87_s19 }
  0x17   :  { %p94_p11 = por %p93_p10, %p92_p9 }
  0x19   :  { %29 = vadd.xlane.f32.xlu0 %v28_v5  ;;  %p95_p12 = pnand %p94_p11, %p88_p8 }
  0xa2   :  { %v25_v6 = vpop.xlane.xlu0 %24 }
  0xa3   :  { %v31_v7 = vmul.f32 0.00390625, %v25_v6 }
  0xa5   :  { %v33_v9 = vmul.f32 %v31_v7, %v31_v7  ;;  %v38_v14 = vsub.f32 0.0, %v31_v7 }
  0xa6   :  { %v30_v8 = vpop.xlane.xlu0 %29 }
  0xa7   :  { %v32_v10 = vmul.f32 0.00390625, %v30_v8 }
  0xa9   :  { %v34_v11 = vsub.f32 %v32_v10, %v33_v9 }
  0xab   :  { %v35_v12 = vmax.f32 %v34_v11, 0.0 }
  0xad   :  { %v36_v13 = vadd.f32 1e-05, %v35_v12 }
  0xaf   :  { %63 = vrsqrt.f32 %v36_v13 }
  0xb9   :  { %v64_v15 = vpop.eup %63 }
  0xba   :  { %v39_v16 = vmul.f32 %v64_v15, %v38_v14  ;;  %v40_v17 = vmul.f32 %v64_v15, %v21_v0  ;;  %v41_v18 = vmul.f32 %v64_v15, %v22_v1 }
  0xbc   :  { %v42_v19 = vadd.f32 %v40_v17, %v39_v16  ;;  %v43_v20 = vadd.f32 %v41_v18, %v39_v16 }
  0xbe   :  { %44 = vst [vmem:[#allocation5] sm:$0xff] %v42_v19  ;;  %45 = vst [vmem:[#allocation5 + $0x8] sm:$0xff] %v43_v20 }
  0xbf   :  { %98 = shalt.err (!%p95_p12)
}
  0xc0   :  { %s99_s22 = scalar_lea.hbm %s150_s1, 256 }
  0xc1   :  { %p100_p13 = scmp.ne.s32.totalorder %s150_s1, %s99_s22  ;;  %p103_p0 = scmp.lt.u32.totalorder %s99_s22, %s150_s1 }
  0xc3   :  { %p105_p1 = pnand %p103_p0, %p100_p13 }
  0xc5   :  { %108 = shalt.err (!%p105_p1)
}
  0xc6   :  { %55 = dma.vmem_to_hbm [thread:$0]  %s53_s18, 256, %s150_s1, [#allocation4]  }
  0xc7   :  { %111 = dma.done.wait [#allocation4], 256  }
  0xc8   :  { %112 = vsyncadd [#allocation4], 4294967040 }
  0xc9   :  { %59 = vsyncpa [#allocation3], 1 }
  0xca   :  { %60 = vsyncpa [#allocation4], 1 }

</bundles_post_ra>
